<compile_context>
chip_gen: v5e
topology: v5e:2x2
jax: 0.10.0
libtpu: 0.0.40
codegen_flags: <defaults>
</compile_context>

<pallas_src>
import jax
import jax.numpy as jnp
from jax.experimental import pallas as pl
from jax.experimental.pallas import tpu as pltpu


# ---------------------------------------------------------------------------
# Pallas kernels
# ---------------------------------------------------------------------------
def selector_kernel(x_ref, w_ref, b_ref, o_ref):
    # logits = x @ W_sel + b_sel ; softmax over expert dim (axis=1).
    # bf16 operands, f32 accumulation on the MXU.
    logits = jnp.dot(x_ref[...], w_ref[...],
                     preferred_element_type=jnp.float32) + b_ref[...]
    logits = logits - jnp.max(logits, axis=1, keepdims=True)
    e = jnp.exp(logits)
    # Divide -> EUP reciprocal (separate VLIW slot, effectively free).
    o_ref[...] = e * pl.reciprocal(jnp.sum(e, axis=1, keepdims=True), approx=True)


def _make_moe_kernel(n_exp, n_out):
    """Fused MoE combine: one (B,nIn)@(nIn,E*nOut) MXU pass, gate+reduce on VPU."""

    def moe_kernel(g_ref, x_ref, w_ref, b_ref, o_ref):
        # Single lane-dense matmul over ALL experts at once (E*nOut lanes).
        y = jnp.dot(x_ref[...], w_ref[...],
                    preferred_element_type=jnp.float32) + b_ref[...]
        g = g_ref[...]                                   # (B, E) gates, resident

        def weighted(e):
            gcol = g[:, e:e + 1]                         # (B, 1)
            yblk = y[:, e * n_out:(e + 1) * n_out]       # (B, nOut) static lane slice
            # Mask zero-gate experts so a non-finite expert output can never
            # propagate through a 0-weight ("expert not run" semantics).
            return jnp.where(gcol > 0.0, gcol * yblk, 0.0)

        acc = weighted(0)
        for e in range(1, n_exp):                        # E is small & static -> unrolled
            acc = acc + weighted(e)
        o_ref[...] = acc

    return moe_kernel


# ---------------------------------------------------------------------------
# pallas_call wrappers
# ---------------------------------------------------------------------------
def selector_softmax(x_bf16, w_sel_bf16, b_sel):
    B, nIn = x_bf16.shape
    E = w_sel_bf16.shape[1]
    return pl.pallas_call(
        selector_kernel,
        out_shape=jax.ShapeDtypeStruct((B, E), jnp.float32),
        grid=(1,),
        in_specs=[
            pl.BlockSpec((B, nIn), lambda i: (0, 0)),
            pl.BlockSpec((nIn, E), lambda i: (0, 0)),
            pl.BlockSpec((1, E), lambda i: (0, 0)),
        ],
        out_specs=pl.BlockSpec((B, E), lambda i: (0, 0)),
        compiler_params=pltpu.CompilerParams(dimension_semantics=("arbitrary",)),
    )(x_bf16, w_sel_bf16, b_sel)


def moe_combine(sparse_weight, x_bf16, w_all_bf16, b_all):
    B, nIn = x_bf16.shape
    E = sparse_weight.shape[1]
    EnOut = w_all_bf16.shape[1]
    nOut = EnOut // E
    # NOTE(production scaling): for large nIn/nOut add B-row / nOut-column tile
    # axes marked "parallel" (v7x: 2 TCs) ahead of any reduction axis, set an
    # explicit vmem_limit_bytes (v7x: 64 MiB physical / 32 MiB scoped default),
    # and for large E scalar-prefetch the list of active (nonzero-gate) experts
    # so the grid only visits them.  At these toy sizes a single full-array
    # block is the right choice.
    return pl.pallas_call(
        _make_moe_kernel(E, nOut),
        out_shape=jax.ShapeDtypeStruct((B, nOut), jnp.float32),
        grid=(1,),
        in_specs=[
            pl.BlockSpec((B, E), lambda i: (0, 0)),         # gates (f32), resident
            pl.BlockSpec((B, nIn), lambda i: (0, 0)),       # inputs (bf16)
            pl.BlockSpec((nIn, EnOut), lambda i: (0, 0)),   # fused expert weights (bf16)
            pl.BlockSpec((1, EnOut), lambda i: (0, 0)),     # fused expert biases (f32)
        ],
        out_specs=pl.BlockSpec((B, nOut), lambda i: (0, 0)),
        compiler_params=pltpu.CompilerParams(dimension_semantics=("arbitrary",)),
    )(sparse_weight, x_bf16, w_all_bf16, b_all)


# ---------------------------------------------------------------------------
# Gating glue (matches torch sparse_MoE exactly on the forward output)
# ---------------------------------------------------------------------------
def sparse_gating(weightMat, eps=0.2):
    B, E = weightMat.shape
    order = jnp.argsort(-weightMat, axis=1)                   # descending sort indices
    topW = jnp.take_along_axis(weightMat, order, axis=1)
    cumW = jnp.cumsum(topW, axis=1)
    capped = jnp.minimum(cumW, 1.0 - eps)
    sparse_sorted = jnp.maximum(capped - cumW + topW, 0.0)    # relu
    shifted = jnp.concatenate(
        [sparse_sorted[:, 1:], jnp.zeros((B, 1), sparse_sorted.dtype)], axis=1)
    softCost = jnp.sum(jnp.where(shifted > 0, 1.0, sparse_sorted), axis=1)
    # torch.gather(sparse_weight, 1, index) applies the forward permutation;
    # take_along_axis with the same indices reproduces it bit-for-bit.
    sparse_weight = jnp.take_along_axis(sparse_sorted, order, axis=1)
    return sparse_weight, softCost


def smoe_forward(x, params, eps=0.2, gEps=0.2):
    x_bf = x.astype(jnp.bfloat16)                  # cast once, reused by both kernels
    weightMat = selector_softmax(x_bf, params["w_sel"], params["b_sel"])
    sparse_weight, softCost = sparse_gating(weightMat, eps)
    # GSW / gEps path only affects the usage mask (routes extra zero-weight
    # samples) -> no effect on the forward output values.
    out = moe_combine(sparse_weight, x_bf, params["w_all"], params["b_all"])
    return out, softCost


def prepare_params(w_sel, b_sel, WE, bE):
    """One-time weight-layout prep: fused (nIn, E*nOut) expert matrix, bf16 casts."""
    E, nIn, nOut = WE.shape
    w_all = jnp.transpose(WE, (1, 0, 2)).reshape(nIn, E * nOut)   # [:, e*nOut+o] = WE[e,:,o]
    b_all = bE.reshape(1, E * nOut)                               # [0, e*nOut+o] = bE[e,o]
    return dict(
        w_sel=w_sel.astype(jnp.bfloat16),
        b_sel=b_sel.astype(jnp.float32),
        w_all=w_all.astype(jnp.bfloat16),
        b_all=b_all.astype(jnp.float32),
    )


# ---------------------------------------------------------------------------
if __name__ == "__main__":
    B, nIn, nOut, E = 8, 32, 32, 4
    sFactor = 5.0

    key = jax.random.PRNGKey(0)
    k1, k2, k3, k4, k5 = jax.random.split(key, 5)

    # TODO(synk): ILBN wrapper is undefined in the reference source; it is
    # treated here as its inner nn.Linear (the `.lin` attribute the code uses).
    bound = 1.0 / float(jnp.sqrt(nIn))
    w_sel = jax.random.uniform(k1, (nIn, E), jnp.float32, -bound, bound) * sFactor
    b_sel = jax.random.uniform(k2, (1, E), jnp.float32, -bound, bound) * sFactor
    # experts: E independent Linear(nIn, nOut) layers, stacked
    WE = jax.random.uniform(k3, (E, nIn, nOut), jnp.float32, -bound, bound)
    bE = jax.random.uniform(k4, (E, nOut), jnp.float32, -bound, bound)

    x = jax.random.normal(k5, (B, nIn), jnp.float32)

    params = prepare_params(w_sel, b_sel, WE, bE)
    fwd = jax.jit(smoe_forward)
    out, cost = fwd(x, params)
    out, cost = jax.block_until_ready((out, cost))

    assert out.shape == (B, nOut) and cost.shape == (B,)
    assert bool(jnp.all(jnp.isfinite(out))) and bool(jnp.all(jnp.isfinite(cost)))

    # Pure-JAX f32 reference of the combine, using the same gates the kernel saw
    # (bf16 input rounding is the only source of difference -> loose tolerance).
    gates, _ = sparse_gating(
        selector_softmax(x.astype(jnp.bfloat16), params["w_sel"], params["b_sel"]))
    ref = sum(gates[:, e:e + 1] * (x @ WE[e] + bE[e]) for e in range(E))
    max_err = float(jnp.max(jnp.abs(out - ref)))
    assert max_err < 0.1, f"mismatch vs f32 reference: {max_err}"

    print("KERNEL_OK")
</pallas_src>

<mosaic_0001>
module attributes {stable_mosaic.version = 11 : i64} {
  func.func @selector_kernel(%arg0: i32, %arg1: memref<8x32xbf16, #tpu.memory_space<vmem>>, %arg2: memref<32x4xbf16, #tpu.memory_space<vmem>>, %arg3: memref<1x4xf32, #tpu.memory_space<vmem>>, %arg4: memref<8x4xf32, #tpu.memory_space<vmem>>) attributes {dimension_semantics = [#tpu.dimension_semantics<arbitrary>], iteration_bounds = array<i64: 1>, scalar_prefetch = 0 : i64, scratch_operands = 0 : i64, tpu.core_type = #tpu.core_type<tc>, window_params = [{pipeline_mode = #tpu.pipeline_mode<synchronous>, transform_indices = @transform_0, window_bounds = array<i64: 8, 32>}, {pipeline_mode = #tpu.pipeline_mode<synchronous>, transform_indices = @transform_1, window_bounds = array<i64: 32, 4>}, {pipeline_mode = #tpu.pipeline_mode<synchronous>, transform_indices = @transform_2, window_bounds = array<i64: 1, 4>}, {pipeline_mode = #tpu.pipeline_mode<synchronous>, transform_indices = @transform_3, window_bounds = array<i64: 8, 4>}]} {
    %c0 = arith.constant 0 : index
    %c0_0 = arith.constant 0 : index
    %0 = vector.load %arg1[%c0, %c0_0] : memref<8x32xbf16, #tpu.memory_space<vmem>>, vector<8x32xbf16>
    %c0_1 = arith.constant 0 : index
    %c0_2 = arith.constant 0 : index
    %1 = vector.load %arg2[%c0_1, %c0_2] : memref<32x4xbf16, #tpu.memory_space<vmem>>, vector<32x4xbf16>
    %cst = arith.constant dense<0.000000e+00> : vector<8x4xf32>
    %2 = tpu.matmul %0, %1, %cst {dimension_numbers = #tpu.dot_dimension_numbers<[1], [0], [0], [1], [0, 0, 1, 1], [], []>} : vector<8x32xbf16>, vector<32x4xbf16>, vector<8x4xf32> -> vector<8x4xf32>
    %c0_3 = arith.constant 0 : index
    %c0_4 = arith.constant 0 : index
    %3 = vector.load %arg3[%c0_3, %c0_4] : memref<1x4xf32, #tpu.memory_space<vmem>>, vector<1x4xf32>
    %4 = vector.broadcast %3 : vector<1x4xf32> to vector<8x4xf32>
    %5 = arith.addf %2, %4 : vector<8x4xf32>
    %cst_5 = arith.constant dense<0xFF800000> : vector<8xf32>
    %6 = vector.multi_reduction <maximumf>, %5, %cst_5 [1] : vector<8x4xf32> to vector<8xf32>
    %7 = vector.shape_cast %6 : vector<8xf32> to vector<8x1xf32>
    %8 = vector.broadcast %7 : vector<8x1xf32> to vector<8x4xf32>
    %9 = arith.subf %5, %8 : vector<8x4xf32>
    %10 = math.exp %9 : vector<8x4xf32>
    %cst_6 = arith.constant dense<0.000000e+00> : vector<8xf32>
    %11 = vector.multi_reduction <add>, %10, %cst_6 [1] : vector<8x4xf32> to vector<8xf32>
    %12 = vector.shape_cast %11 : vector<8xf32> to vector<8x1xf32>
    %13 = tpu.reciprocal %12 {approx = true} : vector<8x1xf32> -> vector<8x1xf32>
    %14 = vector.broadcast %13 : vector<8x1xf32> to vector<8x4xf32>
    %15 = arith.mulf %10, %14 : vector<8x4xf32>
    %c0_7 = arith.constant 0 : index
    %c0_8 = arith.constant 0 : index
    %16 = vector.load %arg4[%c0_7, %c0_8] : memref<8x4xf32, #tpu.memory_space<vmem>>, vector<8x4xf32>
    tpu.vector_store %arg4[%c0_7, %c0_8], %15 {strides = array<i32>} : memref<8x4xf32, #tpu.memory_space<vmem>>, vector<8x4xf32>,
    return
  }
  func.func @transform_0(%arg0: i32) -> (i32, i32) {
    %c0_i32 = arith.constant 0 : i32
    %c0_i32_0 = arith.constant 0 : i32
    %c0_i32_1 = arith.constant 0 : i32
    return %c0_i32, %c0_i32_0 : i32, i32
  }
  func.func @transform_1(%arg0: i32) -> (i32, i32) {
    %c0_i32 = arith.constant 0 : i32
    %c0_i32_0 = arith.constant 0 : i32
    %c0_i32_1 = arith.constant 0 : i32
    return %c0_i32, %c0_i32_0 : i32, i32
  }
  func.func @transform_2(%arg0: i32) -> (i32, i32) {
    %c0_i32 = arith.constant 0 : i32
    %c0_i32_0 = arith.constant 0 : i32
    %c0_i32_1 = arith.constant 0 : i32
    return %c0_i32, %c0_i32_0 : i32, i32
  }
  func.func @transform_3(%arg0: i32) -> (i32, i32) {
    %c0_i32 = arith.constant 0 : i32
    %c0_i32_0 = arith.constant 0 : i32
    %c0_i32_1 = arith.constant 0 : i32
    return %c0_i32, %c0_i32_0 : i32, i32
  }
}

module attributes {stable_mosaic.version = 11 : i64} {
  func.func @moe_kernel(%arg0: i32, %arg1: memref<8x4xf32, #tpu.memory_space<vmem>>, %arg2: memref<8x32xbf16, #tpu.memory_space<vmem>>, %arg3: memref<32x128xbf16, #tpu.memory_space<vmem>>, %arg4: memref<1x128xf32, #tpu.memory_space<vmem>>, %arg5: memref<8x32xf32, #tpu.memory_space<vmem>>) attributes {dimension_semantics = [#tpu.dimension_semantics<arbitrary>], iteration_bounds = array<i64: 1>, scalar_prefetch = 0 : i64, scratch_operands = 0 : i64, tpu.core_type = #tpu.core_type<tc>, window_params = [{pipeline_mode = #tpu.pipeline_mode<synchronous>, transform_indices = @transform_0, window_bounds = array<i64: 8, 4>}, {pipeline_mode = #tpu.pipeline_mode<synchronous>, transform_indices = @transform_1, window_bounds = array<i64: 8, 32>}, {pipeline_mode = #tpu.pipeline_mode<synchronous>, transform_indices = @transform_2, window_bounds = array<i64: 32, 128>}, {pipeline_mode = #tpu.pipeline_mode<synchronous>, transform_indices = @transform_3, window_bounds = array<i64: 1, 128>}, {pipeline_mode = #tpu.pipeline_mode<synchronous>, transform_indices = @transform_4, window_bounds = array<i64: 8, 32>}]} {
    %c0 = arith.constant 0 : index
    %c0_0 = arith.constant 0 : index
    %0 = vector.load %arg2[%c0, %c0_0] : memref<8x32xbf16, #tpu.memory_space<vmem>>, vector<8x32xbf16>
    %c0_1 = arith.constant 0 : index
    %c0_2 = arith.constant 0 : index
    %1 = vector.load %arg3[%c0_1, %c0_2] : memref<32x128xbf16, #tpu.memory_space<vmem>>, vector<32x128xbf16>
    %cst = arith.constant dense<0.000000e+00> : vector<8x128xf32>
    %2 = tpu.matmul %0, %1, %cst {dimension_numbers = #tpu.dot_dimension_numbers<[1], [0], [0], [1], [0, 0, 1, 1], [], []>} : vector<8x32xbf16>, vector<32x128xbf16>, vector<8x128xf32> -> vector<8x128xf32>
    %c0_3 = arith.constant 0 : index
    %c0_4 = arith.constant 0 : index
    %3 = vector.load %arg4[%c0_3, %c0_4] : memref<1x128xf32, #tpu.memory_space<vmem>>, vector<1x128xf32>
    %4 = vector.broadcast %3 : vector<1x128xf32> to vector<8x128xf32>
    %5 = arith.addf %2, %4 : vector<8x128xf32>
    %c0_5 = arith.constant 0 : index
    %c0_6 = arith.constant 0 : index
    %6 = vector.load %arg1[%c0_5, %c0_6] : memref<8x4xf32, #tpu.memory_space<vmem>>, vector<8x4xf32>
    %7 = vector.extract_strided_slice %6 {offsets = [0, 0], sizes = [8, 1], strides = [1, 1]} : vector<8x4xf32> to vector<8x1xf32>
    %8 = vector.extract_strided_slice %5 {offsets = [0, 0], sizes = [8, 32], strides = [1, 1]} : vector<8x128xf32> to vector<8x32xf32>
    %cst_7 = arith.constant 0.000000e+00 : f32
    %9 = vector.broadcast %cst_7 : f32 to vector<8x1xf32>
    %10 = arith.cmpf ogt, %7, %9 : vector<8x1xf32>
    %11 = vector.broadcast %7 : vector<8x1xf32> to vector<8x32xf32>
    %12 = arith.mulf %11, %8 : vector<8x32xf32>
    %cst_8 = arith.constant 0.000000e+00 : f32
    %13 = vector.shape_cast %10 : vector<8x1xi1> to vector<8x1xi1>
    %14 = vector.broadcast %13 : vector<8x1xi1> to vector<8x32xi1>
    %15 = vector.broadcast %cst_8 : f32 to vector<8x32xf32>
    %16 = arith.select %14, %12, %15 : vector<8x32xi1>, vector<8x32xf32>
    %17 = vector.extract_strided_slice %6 {offsets = [0, 1], sizes = [8, 1], strides = [1, 1]} : vector<8x4xf32> to vector<8x1xf32>
    %18 = vector.extract_strided_slice %5 {offsets = [0, 32], sizes = [8, 32], strides = [1, 1]} : vector<8x128xf32> to vector<8x32xf32>
    %cst_9 = arith.constant 0.000000e+00 : f32
    %19 = vector.broadcast %cst_9 : f32 to vector<8x1xf32>
    %20 = arith.cmpf ogt, %17, %19 : vector<8x1xf32>
    %21 = vector.broadcast %17 : vector<8x1xf32> to vector<8x32xf32>
    %22 = arith.mulf %21, %18 : vector<8x32xf32>
    %cst_10 = arith.constant 0.000000e+00 : f32
    %23 = vector.shape_cast %20 : vector<8x1xi1> to vector<8x1xi1>
    %24 = vector.broadcast %23 : vector<8x1xi1> to vector<8x32xi1>
    %25 = vector.broadcast %cst_10 : f32 to vector<8x32xf32>
    %26 = arith.select %24, %22, %25 : vector<8x32xi1>, vector<8x32xf32>
    %27 = arith.addf %16, %26 : vector<8x32xf32>
    %28 = vector.extract_strided_slice %6 {offsets = [0, 2], sizes = [8, 1], strides = [1, 1]} : vector<8x4xf32> to vector<8x1xf32>
    %29 = vector.extract_strided_slice %5 {offsets = [0, 64], sizes = [8, 32], strides = [1, 1]} : vector<8x128xf32> to vector<8x32xf32>
    %cst_11 = arith.constant 0.000000e+00 : f32
    %30 = vector.broadcast %cst_11 : f32 to vector<8x1xf32>
    %31 = arith.cmpf ogt, %28, %30 : vector<8x1xf32>
    %32 = vector.broadcast %28 : vector<8x1xf32> to vector<8x32xf32>
    %33 = arith.mulf %32, %29 : vector<8x32xf32>
    %cst_12 = arith.constant 0.000000e+00 : f32
    %34 = vector.shape_cast %31 : vector<8x1xi1> to vector<8x1xi1>
    %35 = vector.broadcast %34 : vector<8x1xi1> to vector<8x32xi1>
    %36 = vector.broadcast %cst_12 : f32 to vector<8x32xf32>
    %37 = arith.select %35, %33, %36 : vector<8x32xi1>, vector<8x32xf32>
    %38 = arith.addf %27, %37 : vector<8x32xf32>
    %39 = vector.extract_strided_slice %6 {offsets = [0, 3], sizes = [8, 1], strides = [1, 1]} : vector<8x4xf32> to vector<8x1xf32>
    %40 = vector.extract_strided_slice %5 {offsets = [0, 96], sizes = [8, 32], strides = [1, 1]} : vector<8x128xf32> to vector<8x32xf32>
    %cst_13 = arith.constant 0.000000e+00 : f32
    %41 = vector.broadcast %cst_13 : f32 to vector<8x1xf32>
    %42 = arith.cmpf ogt, %39, %41 : vector<8x1xf32>
    %43 = vector.broadcast %39 : vector<8x1xf32> to vector<8x32xf32>
    %44 = arith.mulf %43, %40 : vector<8x32xf32>
    %cst_14 = arith.constant 0.000000e+00 : f32
    %45 = vector.shape_cast %42 : vector<8x1xi1> to vector<8x1xi1>
    %46 = vector.broadcast %45 : vector<8x1xi1> to vector<8x32xi1>
    %47 = vector.broadcast %cst_14 : f32 to vector<8x32xf32>
    %48 = arith.select %46, %44, %47 : vector<8x32xi1>, vector<8x32xf32>
    %49 = arith.addf %38, %48 : vector<8x32xf32>
    %c0_15 = arith.constant 0 : index
    %c0_16 = arith.constant 0 : index
    %50 = vector.load %arg5[%c0_15, %c0_16] : memref<8x32xf32, #tpu.memory_space<vmem>>, vector<8x32xf32>
    tpu.vector_store %arg5[%c0_15, %c0_16], %49 {strides = array<i32>} : memref<8x32xf32, #tpu.memory_space<vmem>>, vector<8x32xf32>,
    return
  }
  func.func @transform_0(%arg0: i32) -> (i32, i32) {
    %c0_i32 = arith.constant 0 : i32
    %c0_i32_0 = arith.constant 0 : i32
    %c0_i32_1 = arith.constant 0 : i32
    return %c0_i32, %c0_i32_0 : i32, i32
  }
  func.func @transform_1(%arg0: i32) -> (i32, i32) {
    %c0_i32 = arith.constant 0 : i32
    %c0_i32_0 = arith.constant 0 : i32
    %c0_i32_1 = arith.constant 0 : i32
    return %c0_i32, %c0_i32_0 : i32, i32
  }
  func.func @transform_2(%arg0: i32) -> (i32, i32) {
    %c0_i32 = arith.constant 0 : i32
    %c0_i32_0 = arith.constant 0 : i32
    %c0_i32_1 = arith.constant 0 : i32
    return %c0_i32, %c0_i32_0 : i32, i32
  }
  func.func @transform_3(%arg0: i32) -> (i32, i32) {
    %c0_i32 = arith.constant 0 : i32
    %c0_i32_0 = arith.constant 0 : i32
    %c0_i32_1 = arith.constant 0 : i32
    return %c0_i32, %c0_i32_0 : i32, i32
  }
  func.func @transform_4(%arg0: i32) -> (i32, i32) {
    %c0_i32 = arith.constant 0 : i32
    %c0_i32_0 = arith.constant 0 : i32
    %c0_i32_1 = arith.constant 0 : i32
    return %c0_i32, %c0_i32_0 : i32, i32
  }
}

</mosaic_0001>

<bundles_post_ra>
// kernel: neg.1
= control target key start
LH: loop header
LB: loop body
LE: loop exit
PB: predicated region body
PF: predicated region fallthrough
CT: control target
= control target key end

     0   :  { %s24_s0 = inlined_call_operand.vmem [shape: f32[8,4], index: 0, kind: input, shape index: {}]   ;;  %s25_s1 = inlined_call_operand.vmem [shape: f32[8,4], index: 1, kind: output, shape index: {}]  }
   0x1   :  { %v2_v0 = vld [vmem:[%s24_s0] sm:$0xff] }
   0x2   :  { %v5_v1 = vxor.u32 2147483648, %v2_v0 }
   0x4   :  { %7 = vst [vmem:[%s25_s1] sm:$0xff] %v5_v1 }

// kernel: smoe_forward.2
= control target key start
LH: loop header
LB: loop body
LE: loop exit
PB: predicated region body
PF: predicated region fallthrough
CT: control target
= control target key end

     0   :  { %vm36_vm0 = vcmask 261120   ;;  %vm53_vm1 = vcmask 31744   ;;  %s124_s1 = inlined_call_operand.vmem [shape: bf16[32,4], index: 1, kind: input, shape index: {}]   ;;  %s125_s2 = inlined_call_operand.vmem [shape: f32[1,4], index: 2, kind: input, shape index: {}]   ;;  %s126_s0 = inlined_call_operand.vmem [shape: bf16[8,32], index: 0, kind: input, shape index: {}]   ;;  %s127_s3 = inlined_call_operand.vmem [shape: f32[8,4], index: 3, kind: output, shape index: {}]  }
   0x1   :  { %v80_v0 = vld [vmem:[%s124_s1 + $0x8] sm:$0xff]  ;;  %v79_v1 = vld [vmem:[%s124_s1] sm:$0xff] }
   0x2   :  { %46 = vmatpush.bf16.msra.mxu0 %v80_v0  ;;  %v15_v2 = vld [vmem:[%s126_s0] sm:$0xf] }
   0x3   :  { %v81_v3 = vld [vmem:[%s125_s2] ss:$0 sm:$0xff] }
   0x6   :  { %47 = vmatpush.bf16.msra.mxu0 %v79_v1 }
   0x9   :  { %78 = vmatmul.msk.bf16.vlgmr.msra.gmra.mxu0 %vm36_vm0, %v15_v2 }
  0x86   :  { %v49_v4 = vpop.f32.mrf.mxu0 }
  0x87   :  { %v50_v5 = vadd.f32 %v81_v3, %v49_v4 }
  0x89   :  { %v54_v6 = vsel %vm53_vm1, %v50_v5, -inf }
  0x8a   :  { %55 = vmax.xlane.f32.xlu0 %v54_v6 }
  0x8e   :  { %v51_v7 = vpop.f32.mrf.mxu0 }
  0xfd   :  { %v56_v8 = vpop.xlane.xlu0 %55 }
  0xfe   :  { %v57_v9 = vsub.f32 %v50_v5, %v56_v8 }
 0x100   :  { %v58_v10 = vmul.f32 1.442695, %v57_v9 }
 0x102   :  { %82 = vpow2.f32 %v58_v10 }
 0x108   :  { %v83_v11 = vpop.eup %82 }
 0x109   :  { %v60_v12 = vsel %vm53_vm1, %v83_v11, 0.0 }
 0x10a   :  { %61 = vadd.xlane.f32.xlu0 %v60_v12 }
 0x17d   :  { %v62_v13 = vpop.xlane.xlu0 %61 }
 0x17e   :  { %84 = vrcp.f32 %v62_v13 }
 0x184   :  { %v85_v14 = vpop.eup %84 }
 0x185   :  { %v64_v15 = vmul.f32 %v85_v14, %v83_v11 }
 0x187   :  { %65 = vst.msk [vmem:[%s127_s3] sm:$0xff] %vm53_vm1, %v64_v15 }

// kernel: smoe_forward.3
= control target key start
LH: loop header
LB: loop body
LE: loop exit
PB: predicated region body
PF: predicated region fallthrough
CT: control target
= control target key end

     0   :  { %v185_v2 = vmov 1   ;;  %v186_v3 = vmov 2   ;;  %s238_s0 = inlined_call_operand.vmem [shape: f32[8,4], index: 0, kind: input, shape index: {}]   ;;  %s239_s1 = inlined_call_operand.vmem [shape: bf16[8,32], index: 1, kind: input, shape index: {}]   ;;  %s240_s2 = inlined_call_operand.vmem [shape: bf16[32,128], index: 2, kind: input, shape index: {}]   ;;  %s241_s3 = inlined_call_operand.vmem [shape: f32[1,128], index: 3, kind: input, shape index: {}]   ;;  %s242_s4 = inlined_call_operand.hbm [shape: f32[8,32], index: 4, kind: output, shape index: {}]  }
   0x1   :  { %v143_v0 = vld [vmem:[%s240_s2 + $0x8] sm:$0xff]  ;;  %v57_v1 = vld [vmem:[%s238_s0] sm:$0xff]  ;;  %152 = vset.pattern.permute.xlu0 %v185_v2  ;;  %153 = vset.pattern.permute.xlu1 %v186_v3 }
   0x2   :  { %50 = vmatpush.bf16.msra.mxu0 %v143_v0  ;;  %72 = vperm.xlu0 %152, %v57_v1   ;;  %v142_v4 = vld [vmem:[%s240_s2] sm:$0xff] }
   0x3   :  { %9 = vsyncpa [#allocation3], 0  ;;  %87 = vperm.xlu1 %153, %v57_v1   ;;  %v187_v5 = vmov 3   ;;  %vm58_vm0 = vcmp.gt.f32.partialorder %v57_v1, 0.0  ;;  %v19_v6 = vld [vmem:[%s239_s1] sm:$0xf] }
   0x4   :  { %154 = vset.pattern.permute.xlu2 %v187_v5  ;;  %vm40_vm1 = vcmask 261120   ;;  %v188_v7 = vmov 0   ;;  %v158_v12 = vld [vmem:[%s241_s3] ss:$0 sm:$0xff]  ;;  %s189_s1 = smov 64   ;;  %s190_s23 = smov 96  }
   0x5   :  { %102 = vperm.xlu2 %154, %v57_v1   ;;  %v65_v8 = vsel %vm58_vm0, 1, %v188_v7  ;;  %s191_s3 = smov 32   ;;  %s192_s24 = smov [#allocation2]  }
   0x6   :  { %51 = vmatpush.bf16.msra.mxu0 %v142_v4  ;;  %s122_s25 = sshll.u32 %s192_s24, 4  ;;  %s124_s28 = sshll.u32 %s242_s4, 4  ;;  %s123_s25 = int_to_ptr.vmem [resolvable:$true] %s122_s25  ;;  %s125_s28 = int_to_ptr.hbm [resolvable:$true] %s124_s28 }
   0x9   :  { %141 = vmatmul.msk.bf16.vlgmr.msra.gmra.mxu0 %vm40_vm1, %v19_v6 }
   0xa   :  { %77 = vperm.xlu0 %152, %v65_v8  }
   0xb   :  { %92 = vperm.xlu1 %153, %v65_v8  }
   0xd   :  { %107 = vperm.xlu2 %154, %v65_v8  }
  0x12   :  { %155 = vset.pattern.permute.xlu0 %v188_v7 }
  0x13   :  { %156 = vset.pattern.permute.xlu1 %v188_v7  ;;  %61 = vperm.xlu0 %155, %v57_v1  }
  0x14   :  { %67 = vperm.xlu1 %156, %v65_v8  }
  0x1b   :  { %157 = vset.pattern.permute.xlu0 %v187_v5 }
  0x5f   :  { %v103_v11 = vpop.permute.xlu2 %102 }
  0x67   :  { %v108_v21 = vpop.permute.xlu2 %107 }
  0x68   :  { %vm109_vm4 = vcmp.eq.s32.totalorder %v108_v21, 1 }
  0x74   :  { %v73_v9 = vpop.permute.xlu0 %72 }
  0x75   :  { %v88_v10 = vpop.permute.xlu1 %87 }
  0x7c   :  { %v78_v14 = vpop.permute.xlu0 %77 }
  0x7d   :  { %v93_v15 = vpop.permute.xlu1 %92  ;;  %vm79_vm2 = vcmp.eq.s32.totalorder %v78_v14, 1 }
  0x7e   :  { %vm94_vm3 = vcmp.eq.s32.totalorder %v93_v15, 1 }
  0x85   :  { %v62_v25 = vpop.permute.xlu0 %61 }
  0x86   :  { %v53_v13 = vpop.f32.mrf.mxu0  ;;  %v68_v26 = vpop.permute.xlu1 %67 }
  0x87   :  { %v54_v16 = vadd.f32 %v158_v12, %v53_v13  ;;  %vm69_vm5 = vcmp.eq.s32.totalorder %v68_v26, 1 }
  0x89   :  { %v90_v17 = vmul.f32 %v88_v10, %v54_v16  ;;  %v75_v18 = vmul.f32 %v73_v9, %v54_v16  ;;  %v105_v23 = vmul.f32 %v103_v11, %v54_v16  ;;  %v64_v28 = vmul.f32 %v62_v25, %v54_v16 }
  0x8b   :  { %v95_v19 = vsel %vm94_vm3, %v90_v17, 0.0  ;;  %v80_v20 = vsel %vm79_vm2, %v75_v18, 0.0  ;;  %v110_v24 = vsel %vm109_vm4, %v105_v23, 0.0  ;;  %v70_v29 = vsel %vm69_vm5, %v64_v28, 0.0 }
  0x8c   :  { %97 = vrot.lane.b32.xlu1 %v95_v19, %s189_s1  ;;  %82 = vrot.lane.b32.xlu2 %v80_v20, %s190_s23 }
  0x8e   :  { %v55_v22 = vpop.f32.mrf.mxu0 }
  0x94   :  { %112 = vrot.lane.b32.xlu2 %v110_v24, %s191_s3 }
  0xe6   :  { %v83_v27 = vpop.permute.xlu2 %82 }
  0xe7   :  { %v85_v30 = vadd.f32 %v83_v27, %v70_v29 }
  0xee   :  { %v113_v33 = vpop.permute.xlu2 %112 }
  0xfe   :  { %v98_v31 = vpop.permute.xlu1 %97 }
  0xff   :  { %v100_v32 = vadd.f32 %v98_v31, %v85_v30 }
 0x101   :  { %v115_v34 = vadd.f32 %v113_v33, %v100_v32 }
 0x103   :  { %116 = vst.msk [vmem:[#allocation2] sm:$0xff] %vm40_vm1, %v115_v34 }
 0x104   :  { %127 = dma.vmem_to_hbm [thread:$0]  %s123_s25, 128, %s125_s28, [#allocation3]  }
 0x105   :  { %183 = dma.done.wait [#allocation3], 128  }
 0x106   :  { %184 = vsyncadd [#allocation3], 4294967168 }
 0x107   :  { %132 = vsyncpa [#allocation3], 1 }

</bundles_post_ra>
